<compile_context>
chip_gen: v5e
topology: v5e:2x2
jax: 0.10.0
libtpu: 0.0.40
codegen_flags: <defaults>
</compile_context>

<pallas_src>
import functools

import jax
import jax.numpy as jnp
from jax import lax
from jax.experimental import pallas as pl
from jax.experimental.pallas import tpu as pltpu

_L2_EPS = 1e-10
_LOSS_EPS = 1e-06


def _round_up(x, m):
    return ((x + m - 1) // m) * m


def _super_identity_loss_kernel(x_ref, y_ref, o_ref, acc_ref, *, inv_n, tile_b):
    """One grid step over a (tile_b, F) block of X and Y."""
    step = pl.program_id(0)

    @pl.when(step == 0)
    def _init():
        acc_ref[...] = jnp.zeros_like(acc_ref)

    x = x_ref[...].astype(jnp.float32)
    y = y_ref[...].astype(jnp.float32)

    # Row-wise L2 normalization (PyTorch dim=1) via rsqrt * multiply (EUP + VPU).
    x_inv = lax.rsqrt(jnp.sum(x * x, axis=1, keepdims=True) + _L2_EPS)
    y_inv = lax.rsqrt(jnp.sum(y * y, axis=1, keepdims=True) + _L2_EPS)

    diff = x * x_inv - y * y_inv
    d2 = diff * diff  # loss eps is added once at the end (mean(d^2+c) == mean(d^2)+c)

    # Fold (tile_b, F) into the (8, F) accumulator with pure VPU adds:
    # split the sublane axis into groups of 8 (aligned with native (8,128) tiling)
    # and sum over the group axis — no cross-lane/XLU work per step.
    feat = d2.shape[-1]
    groups = tile_b // 8
    acc_ref[...] += jnp.sum(d2.reshape(groups, 8, feat), axis=0)

    @pl.when(step == pl.num_programs(0) - 1)
    def _finalize():
        # Single XLU reduce at the very end, then the scalar epilogue.
        o_ref[0, 0] = jnp.sum(acc_ref[...]) * inv_n + _LOSS_EPS


def super_identity_loss(x, y, *, tile_b=None):
    """loss = mean((L2Norm(X) - L2Norm(Y))**2 + 1e-6), X/Y of shape (batch, features)."""
    assert x.shape == y.shape and x.ndim == 2, "expects 2-D (batch, features)"
    batch, feat = x.shape
    total_elems = batch * feat  # GLOBAL element count (pre-padding)

    # Row tile: multiple of 8 (f32 sublane) / 16 (bf16 packing); as large as
    # reasonable so the kernel runs near the HBM roofline.
    row_mult = 16 if x.dtype == jnp.bfloat16 else 8
    if tile_b is None:
        tile_b = min(512, _round_up(batch, row_mult))
    tile_b = max(row_mult, _round_up(tile_b, row_mult))

    # Pad the batch with zero rows so batch % tile_b == 0.  Zero rows normalize
    # to exactly zero (0 * rsqrt(1e-10) == 0), so they contribute nothing to the
    # accumulated sum; we divide by the real element count below.
    padded_batch = _round_up(batch, tile_b)
    if padded_batch != batch:
        pad = padded_batch - batch
        x = jnp.pad(x, ((0, pad), (0, 0)))
        y = jnp.pad(y, ((0, pad), (0, 0)))
    grid = (padded_batch // tile_b,)

    # VMEM budget: 2 inputs x 2 pipeline buffers x block, plus the small scratch.
    itemsize = jnp.dtype(x.dtype).itemsize
    block_bytes = tile_b * feat * itemsize
    needed = 2 * 2 * block_bytes + 8 * feat * 4 + (2 << 20)
    vmem_limit = int(min(max(needed, 16 << 20), 64 << 20))

    kernel = functools.partial(
        _super_identity_loss_kernel,
        inv_n=1.0 / float(total_elems),
        tile_b=tile_b,
    )

    out = pl.pallas_call(
        kernel,
        out_shape=jax.ShapeDtypeStruct((1, 1), jnp.float32),
        grid_spec=pltpu.PrefetchScalarGridSpec(
            num_scalar_prefetch=0,
            grid=grid,
            in_specs=[
                pl.BlockSpec((tile_b, feat), lambda i: (i, 0)),
                pl.BlockSpec((tile_b, feat), lambda i: (i, 0)),
            ],
            out_specs=pl.BlockSpec((1, 1), lambda i: (0, 0), memory_space=pltpu.SMEM),
            scratch_shapes=[pltpu.VMEM((8, feat), jnp.float32)],
        ),
        compiler_params=pltpu.CompilerParams(
            dimension_semantics=("arbitrary",),  # grid axis is a reduction (accumulator)
            vmem_limit_bytes=vmem_limit,
        ),
    )(x, y)
    return out[0, 0]
    # TODO(synk): optional v7x-only variant — add a leading size-2 "parallel" axis
    # splitting the batch across both TensorCores with per-core partial sums
    # combined in the wrapper (roughly 2x effective HBM bandwidth on v7x).


def _reference_loss(x, y):
    x = x.astype(jnp.float32)
    y = y.astype(jnp.float32)
    xn = x / jnp.sqrt(jnp.sum(x * x, axis=1, keepdims=True) + _L2_EPS)
    yn = y / jnp.sqrt(jnp.sum(y * y, axis=1, keepdims=True) + _L2_EPS)
    d = xn - yn
    return jnp.mean(d * d + _LOSS_EPS)


if __name__ == "__main__":
    key = jax.random.PRNGKey(0)

    # Small, tile-friendly case (single grid step).
    kx, ky = jax.random.split(key)
    X = jax.random.normal(kx, (8, 128), dtype=jnp.float32)
    Y = jax.random.normal(ky, (8, 128), dtype=jnp.float32)
    loss = jax.block_until_ready(super_identity_loss(X, Y))
    ref = jax.block_until_ready(_reference_loss(X, Y))
    assert jnp.allclose(loss, ref, rtol=1e-5, atol=1e-6), (loss, ref)

    # Tiled + padded case: batch not a multiple of the tile -> exercises the
    # multi-step accumulator and zero-row padding paths.
    kx2, ky2 = jax.random.split(jax.random.PRNGKey(1))
    X2 = jax.random.normal(kx2, (200, 128), dtype=jnp.float32)
    Y2 = jax.random.normal(ky2, (200, 128), dtype=jnp.float32)
    loss2 = jax.block_until_ready(super_identity_loss(X2, Y2, tile_b=64))
    ref2 = jax.block_until_ready(_reference_loss(X2, Y2))
    assert jnp.allclose(loss2, ref2, rtol=1e-5, atol=1e-6), (loss2, ref2)

    print("KERNEL_OK")
</pallas_src>

<mosaic_0001>
module attributes {stable_mosaic.version = 11 : i64} {
  func.func @_super_identity_loss_kernel(%arg0: i32, %arg1: memref<8x128xf32, #tpu.memory_space<vmem>>, %arg2: memref<8x128xf32, #tpu.memory_space<vmem>>, %arg3: memref<1x1xf32, #tpu.memory_space<smem>>, %arg4: memref<8x128xf32, #tpu.memory_space<vmem>>) attributes {dimension_semantics = [#tpu.dimension_semantics<arbitrary>], iteration_bounds = array<i64: 1>, scalar_prefetch = 0 : i64, scratch_operands = 1 : i64, tpu.core_type = #tpu.core_type<tc>, window_params = [{transform_indices = @transform_0, window_bounds = array<i64: 8, 128>}, {transform_indices = @transform_1, window_bounds = array<i64: 8, 128>}, {transform_indices = @transform_2, window_bounds = array<i64: 1, 1>}]} {
    %c0_i32 = arith.constant 0 : i32
    %0 = arith.cmpi eq, %arg0, %c0_i32 : i32
    %1 = arith.extui %0 : i1 to i32
    %c0_i32_0 = arith.constant 0 : i32
    %2 = arith.cmpi ne, %1, %c0_i32_0 : i32
    scf.if %2 {
      %cst_14 = arith.constant 0.000000e+00 : f32
      %31 = vector.broadcast %cst_14 : f32 to vector<8x128xf32>
      %c0_15 = arith.constant 0 : index
      %c0_16 = arith.constant 0 : index
      %32 = vector.load %arg4[%c0_15, %c0_16] : memref<8x128xf32, #tpu.memory_space<vmem>>, vector<8x128xf32>
      tpu.vector_store %arg4[%c0_15, %c0_16], %31 {strides = array<i32>} : memref<8x128xf32, #tpu.memory_space<vmem>>, vector<8x128xf32>,
    } else {
    }
    %c0 = arith.constant 0 : index
    %c0_1 = arith.constant 0 : index
    %3 = vector.load %arg1[%c0, %c0_1] : memref<8x128xf32, #tpu.memory_space<vmem>>, vector<8x128xf32>
    %c0_2 = arith.constant 0 : index
    %c0_3 = arith.constant 0 : index
    %4 = vector.load %arg2[%c0_2, %c0_3] : memref<8x128xf32, #tpu.memory_space<vmem>>, vector<8x128xf32>
    %5 = arith.mulf %3, %3 : vector<8x128xf32>
    %cst = arith.constant dense<0.000000e+00> : vector<8xf32>
    %6 = vector.multi_reduction <add>, %5, %cst [1] : vector<8x128xf32> to vector<8xf32>
    %7 = vector.shape_cast %6 : vector<8xf32> to vector<8x1xf32>
    %cst_4 = arith.constant 1.000000e-10 : f32
    %8 = vector.broadcast %cst_4 : f32 to vector<8x1xf32>
    %9 = arith.addf %7, %8 : vector<8x1xf32>
    %10 = math.rsqrt %9 : vector<8x1xf32>
    %11 = arith.mulf %4, %4 : vector<8x128xf32>
    %cst_5 = arith.constant dense<0.000000e+00> : vector<8xf32>
    %12 = vector.multi_reduction <add>, %11, %cst_5 [1] : vector<8x128xf32> to vector<8xf32>
    %13 = vector.shape_cast %12 : vector<8xf32> to vector<8x1xf32>
    %cst_6 = arith.constant 1.000000e-10 : f32
    %14 = vector.broadcast %cst_6 : f32 to vector<8x1xf32>
    %15 = arith.addf %13, %14 : vector<8x1xf32>
    %16 = math.rsqrt %15 : vector<8x1xf32>
    %17 = vector.broadcast %10 : vector<8x1xf32> to vector<8x128xf32>
    %18 = arith.mulf %3, %17 : vector<8x128xf32>
    %19 = vector.broadcast %16 : vector<8x1xf32> to vector<8x128xf32>
    %20 = arith.mulf %4, %19 : vector<8x128xf32>
    %21 = arith.subf %18, %20 : vector<8x128xf32>
    %22 = arith.mulf %21, %21 : vector<8x128xf32>
    %c0_7 = arith.constant 0 : index
    %c0_8 = arith.constant 0 : index
    %23 = vector.load %arg4[%c0_7, %c0_8] : memref<8x128xf32, #tpu.memory_space<vmem>>, vector<8x128xf32>
    %24 = vector.shape_cast %22 : vector<8x128xf32> to vector<1x8x128xf32>
    %cst_9 = arith.constant dense<0.000000e+00> : vector<8x128xf32>
    %25 = vector.multi_reduction <add>, %24, %cst_9 [0] : vector<1x8x128xf32> to vector<8x128xf32>
    %26 = arith.addf %23, %25 : vector<8x128xf32>
    %c0_10 = arith.constant 0 : index
    %c0_11 = arith.constant 0 : index
    %27 = vector.load %arg4[%c0_10, %c0_11] : memref<8x128xf32, #tpu.memory_space<vmem>>, vector<8x128xf32>
    tpu.vector_store %arg4[%c0_10, %c0_11], %26 {strides = array<i32>} : memref<8x128xf32, #tpu.memory_space<vmem>>, vector<8x128xf32>,
    %c0_i32_12 = arith.constant 0 : i32
    %28 = arith.cmpi eq, %arg0, %c0_i32_12 : i32
    %29 = arith.extui %28 : i1 to i32
    %c0_i32_13 = arith.constant 0 : i32
    %30 = arith.cmpi ne, %29, %c0_i32_13 : i32
    scf.if %30 {
      %c0_14 = arith.constant 0 : index
      %c0_15 = arith.constant 0 : index
      %31 = vector.load %arg4[%c0_14, %c0_15] : memref<8x128xf32, #tpu.memory_space<vmem>>, vector<8x128xf32>
      %32 = vector.shape_cast %31 : vector<8x128xf32> to vector<1x8x128xf32>
      %cst_16 = arith.constant dense<0.000000e+00> : vector<1xf32>
      %33 = vector.multi_reduction <add>, %32, %cst_16 [1, 2] : vector<1x8x128xf32> to vector<1xf32>
      %34 = vector.shape_cast %33 : vector<1xf32> to vector<1x1x1xf32>
      %35 = vector.extract %34[0, 0, 0] : f32 from vector<1x1x1xf32>
      %cst_17 = arith.constant 9.765625E-4 : f32
      %36 = arith.mulf %35, %cst_17 : f32
      %cst_18 = arith.constant 9.99999997E-7 : f32
      %37 = arith.addf %36, %cst_18 : f32
      %c0_19 = arith.constant 0 : index
      %c0_20 = arith.constant 0 : index
      %38 = memref.load %arg3[%c0_19, %c0_20] : memref<1x1xf32, #tpu.memory_space<smem>>
      memref.store %37, %arg3[%c0_19, %c0_20] : memref<1x1xf32, #tpu.memory_space<smem>>
    } else {
    }
    return
  }
  func.func @transform_0(%arg0: i32) -> (i32, i32) {
    %c0_i32 = arith.constant 0 : i32
    %c0_i32_0 = arith.constant 0 : i32
    return %arg0, %c0_i32 : i32, i32
  }
  func.func @transform_1(%arg0: i32) -> (i32, i32) {
    %c0_i32 = arith.constant 0 : i32
    %c0_i32_0 = arith.constant 0 : i32
    return %arg0, %c0_i32 : i32, i32
  }
  func.func @transform_2(%arg0: i32) -> (i32, i32) {
    %c0_i32 = arith.constant 0 : i32
    %c0_i32_0 = arith.constant 0 : i32
    %c0_i32_1 = arith.constant 0 : i32
    return %c0_i32, %c0_i32_0 : i32, i32
  }
}

</mosaic_0001>

<bundles_post_ra>
// kernel: tpu_custom_call.1
= control target key start
LH: loop header
LB: loop body
LE: loop exit
PB: predicated region body
PF: predicated region fallthrough
CT: control target
= control target key end

     0   :  { %7 = vsyncpa [#allocation4], 0  ;;  %s219_s0 = inlined_call_operand.hbm [shape: f32[8,128], index: 0, kind: input, shape index: {}]   ;;  %s220_s1 = inlined_call_operand.hbm [shape: f32[8,128], index: 1, kind: input, shape index: {}]   ;;  %s221_s2 = inlined_call_operand.hbm [shape: f32[1,1], index: 2, kind: output, shape index: {}]  }
   0x1   :  { %8 = vsyncpa [#allocation7], 0 }
   0x2   :  { %9 = vsyncpa [#allocation5], 0  ;;  %s15_s11 = sshll.u32 %s219_s0, 4  ;;  %s192_s12 = smov [#allocation3]   ;;  %s16_s11 = int_to_ptr.hbm [resolvable:$true] %s15_s11 }
   0x3   :  { %s17_s13 = sshll.u32 %s192_s12, 4  ;;  %s26_s16 = sshll.u32 %s220_s1, 4  ;;  %s18_s13 = int_to_ptr.vmem [resolvable:$true] %s17_s13  ;;  %s27_s16 = int_to_ptr.hbm [resolvable:$true] %s26_s16 }
   0x4   :  { %20 = dma.hbm_to_vmem [thread:$0]  %s16_s11, 128, %s18_s13, [#allocation4]  }
   0x5   :  { %s193_s17 = smov [#allocation6]  }
   0x6   :  { %s28_s18 = sshll.u32 %s193_s17, 4  ;;  %s29_s18 = int_to_ptr.vmem [resolvable:$true] %s28_s18 }
   0x7   :  { %31 = dma.hbm_to_vmem [thread:$0]  %s27_s16, 128, %s29_s18, [#allocation7]  }
   0x8   :  { %186 = dma.done.wait [#allocation4], 128  }
   0x9   :  { %187 = vsyncadd [#allocation4], 4294967168 }
   0xa   :  { %188 = dma.done.wait [#allocation7], 128  }
   0xb   :  { %189 = vsyncadd [#allocation7], 4294967168  ;;  %v45_v0 = vld [vmem:[#allocation3] sm:$0xff]  ;;  %v46_v2 = vld [vmem:[#allocation6] sm:$0xff]  ;;  %s105_s19 = sshll.u32 %s221_s2, 4  ;;  %s194_s23 = smov [#allocation8]   ;;  %s106_s19 = int_to_ptr.hbm [resolvable:$true] %s105_s19 }
   0xc   :  { %v47_v1 = vmul.f32 %v45_v0, %v45_v0  ;;  %v61_v3 = vmul.f32 %v46_v2, %v46_v2 }
   0xe   :  { %48 = vadd.xlane.f32.xlu0 %v47_v1 }
  0x16   :  { %62 = vadd.xlane.f32.xlu0 %v61_v3 }
  0x81   :  { %v49_v4 = vpop.xlane.xlu0 %48 }
  0x82   :  { %v50_v5 = vadd.f32 1e-10, %v49_v4 }
  0x84   :  { %122 = vrsqrt.f32 %v50_v5  ;;  %vm57_vm1 = vweird.f32 %v50_v5 }
  0x89   :  { %v63_v6 = vpop.xlane.xlu0 %62 }
  0x8a   :  { %v123_v7 = vpop.eup %122  ;;  %v64_v8 = vadd.f32 1e-10, %v63_v6 }
  0x8b   :  { %v52_v9 = vmul.f32 %v123_v7, %v50_v5  ;;  %vm58_vm0 = vweird.f32 %v123_v7 }
  0x8c   :  { %124 = vrsqrt.f32 %v64_v8  ;;  %vm59_vm3 = vmor %vm57_vm1, %vm58_vm0  ;;  %vm71_vm4 = vweird.f32 %v64_v8 }
  0x8d   :  { %v53_v10 = vmul.f32 %v123_v7, %v52_v9 }
  0x8f   :  { %v54_v11 = vmul.f32 0.5, %v53_v10 }
  0x91   :  { %v55_v13 = vsub.f32 1.5, %v54_v11 }
  0x92   :  { %v125_v12 = vpop.eup %124 }
  0x93   :  { %v66_v14 = vmul.f32 %v125_v12, %v64_v8  ;;  %v56_v17 = vmul.f32 %v123_v7, %v55_v13  ;;  %vm72_vm2 = vweird.f32 %v125_v12 }
  0x94   :  { %vm73_vm5 = vmor %vm71_vm4, %vm72_vm2 }
  0x95   :  { %v67_v15 = vmul.f32 %v125_v12, %v66_v14  ;;  %v60_v19 = vsel %vm59_vm3, %v123_v7, %v56_v17 }
  0x96   :  { %v75_v22 = vmul.f32 %v60_v19, %v45_v0 }
  0x97   :  { %v68_v16 = vmul.f32 0.5, %v67_v15 }
  0x99   :  { %v69_v18 = vsub.f32 1.5, %v68_v16 }
  0x9b   :  { %v70_v20 = vmul.f32 %v125_v12, %v69_v18 }
  0x9d   :  { %v74_v21 = vsel %vm73_vm5, %v125_v12, %v70_v20 }
  0x9e   :  { %v76_v23 = vmul.f32 %v74_v21, %v46_v2 }
  0xa0   :  { %v77_v24 = vsub.f32 %v75_v22, %v76_v23 }
  0xa2   :  { %v78_v25 = vmul.f32 %v77_v24, %v77_v24 }
  0xa4   :  { %87 = vadd.xlane.f32.xlu1 %v78_v25 }
 0x117   :  { %v88_v26 = vpop.xlane.xlu1 %87 }
 0x118   :  { %v89_v27 = vrot.slane %v88_v26, 4 }
 0x11a   :  { %v90_v28 = vadd.f32 %v89_v27, %v88_v26 }
 0x11c   :  { %v91_v29 = vrot.slane %v90_v28, 2 }
 0x11e   :  { %v92_v30 = vadd.f32 %v91_v29, %v90_v28 }
 0x120   :  { %v93_v31 = vrot.slane %v92_v30, 1 }
 0x122   :  { %v94_v32 = vadd.f32 %v93_v31, %v92_v30 }
 0x124   :  { %117 = vpush %v94_v32 }
 0x155   :  { %s118_s20 = spop %117 }
 0x156   :  { %s96_s21 = smul.f32 0.0009765625, %s118_s20 }
 0x158   :  { %s97_s22 = sadd.f32 1e-06, %s96_s21 }
 0x15a   :  { %99 = sst [smem:[#allocation8]] %s97_s22 }
 0x15b   :  { %108 = dma.smem_to_hbm %s194_s23, 16, %s106_s19, [#allocation5]  }
 0x15c   :  { %190 = dma.done.wait [#allocation5], 16  }
 0x15d   :  { %191 = vsyncadd [#allocation5], 4294967280 }
 0x15e   :  { %113 = sfence }
 0x15f   :  { %114 = vsyncpa [#allocation4], 1 }
 0x160   :  { %115 = vsyncpa [#allocation7], 1 }
 0x161   :  { %116 = vsyncpa [#allocation5], 1 }

</bundles_post_ra>
